<compile_context>
chip_gen: v5e
topology: v5e:2x2
jax: 0.10.0
libtpu: 0.0.40
codegen_flags: <defaults>
</compile_context>

<pallas_src>
import functools

import jax
import jax.numpy as jnp
from jax.experimental import pallas as pl
from jax.experimental.pallas import tpu as pltpu


def _round_up(x, m):
    return (x + m - 1) // m * m


def _encoder_kernel(x_ref, w_ref, bn_ref, a_ref, o_ref, *, batch, n_input, dpad):
    # x_ref:  (B, n_input)       f32   unpadded input (resident, fetched once)
    # w_ref:  (1, DPAD, DPAD)    bf16  this layer's pre-transposed padded weight
    # bn_ref: (1, 2, DPAD)       f32   rows = [BN gamma, BN beta]
    # a_ref:  (L,)               f32   PReLU slopes (SMEM)
    # o_ref:  (B, DPAD)          f32   persistent activation buffer / final output
    layer = pl.program_id(0)

    @pl.when(layer == 0)
    def _init():
        # Zero-extend x to DPAD lanes in VMEM (no HBM-side padding).
        o_ref[...] = jnp.zeros((batch, dpad), jnp.float32)
        o_ref[:, 0:n_input] = x_ref[...]

    h = o_ref[...]                                       # (B, DPAD) f32
    wt = w_ref[0]                                        # (DPAD, DPAD) bf16

    # Linear (bias dropped: cancelled by training-mode BN mean subtraction).
    z = jnp.dot(h.astype(jnp.bfloat16), wt, preferred_element_type=jnp.float32)

    # BatchNorm1d, training mode: batch stats, biased variance, two-pass.
    inv_b = 1.0 / float(batch)
    mean = jnp.sum(z, axis=0, keepdims=True) * inv_b
    zc = z - mean
    var = jnp.sum(zc * zc, axis=0, keepdims=True) * inv_b
    inv_std = jax.lax.rsqrt(var + 1e-5)

    gamma = bn_ref[0, 0:1, :]                            # (1, DPAD) direct row load
    beta = bn_ref[0, 1:2, :]                             # (1, DPAD) direct row load
    y = zc * (gamma * inv_std) + beta

    # PReLU with a single shared slope per layer (scalar from SMEM).
    a = a_ref[layer]
    o_ref[...] = jnp.where(y > 0.0, y, a * y)


def encoder_pallas(x, wts, bn, alphas, *, dpad):
    """Run the fused encoder. x: (B, n_input) f32 (unpadded)."""
    B, n_input = x.shape
    L = wts.shape[0]

    # Explicit VMEM budget (double-buffered streamed weights + resident acts).
    need = (2 * dpad * dpad * 2      # 2x bf16 weight tiles (double buffer)
            + 2 * 2 * dpad * 4       # 2x gamma/beta tiles
            + B * n_input * 4        # resident input
            + B * dpad * 4)          # resident activation / output tile
    vmem_limit = int(min(max(4 * need + (2 << 20), 4 << 20), 48 << 20))

    kernel = functools.partial(_encoder_kernel, batch=B, n_input=n_input, dpad=dpad)
    return pl.pallas_call(
        kernel,
        out_shape=jax.ShapeDtypeStruct((B, dpad), jnp.float32),
        grid=(L,),
        in_specs=[
            pl.BlockSpec((B, n_input), lambda l: (0, 0)),      # input (resident)
            pl.BlockSpec((1, dpad, dpad), lambda l: (l, 0, 0)),  # streamed weights
            pl.BlockSpec((1, 2, dpad), lambda l: (l, 0, 0)),     # streamed gamma/beta
            pl.BlockSpec(memory_space=pltpu.SMEM),               # PReLU slopes
        ],
        out_specs=pl.BlockSpec((B, dpad), lambda l: (0, 0)),     # persistent acts
        compiler_params=pltpu.CompilerParams(
            dimension_semantics=("arbitrary",),
            vmem_limit_bytes=vmem_limit,
        ),
    )(x, wts, bn, alphas)


def xavier_uniform(key, fan_out, fan_in):
    limit = jnp.sqrt(6.0 / (fan_in + fan_out))
    return jax.random.uniform(
        key, (fan_out, fan_in), jnp.float32, minval=-limit, maxval=limit
    )


def init_encoder_params(key, n_input, n_latent, layer_sizes):
    sizes = [n_input] + list(layer_sizes) + [n_latent]
    L = len(sizes) - 1
    dpad = max(128, _round_up(max(sizes), 128))

    wts = jnp.zeros((L, dpad, dpad), jnp.float32)
    bn = jnp.zeros((L, 2, dpad), jnp.float32)        # rows: [gamma, beta]
    alphas = jnp.full((L,), 0.25, jnp.float32)       # PReLU default init

    for idx in range(L):
        din, dout = sizes[idx], sizes[idx + 1]
        key, kw = jax.random.split(key)
        w = xavier_uniform(kw, dout, din)            # (dout, din), like nn.Linear
        wts = wts.at[idx, :din, :dout].set(w.T)      # pre-transposed, zero-padded
        bn = bn.at[idx, 0, :dout].set(1.0)           # gamma (padded lanes stay 0)
        # beta defaults to 0 (already zeros).
        # NOTE: nn.Linear bias is intentionally not materialized -- training-mode
        # BatchNorm subtracts the batch mean, so a per-feature bias cancels and
        # has no effect on the forward value.

    return dict(
        wts=wts.astype(jnp.bfloat16),                # pre-cast once for the MXU
        bn=bn,
        alphas=alphas,
        sizes=tuple(sizes),
        dpad=dpad,
    )


@functools.partial(jax.jit, static_argnames=("n_latent", "dpad"))
def _forward_impl(x, wts, bn, alphas, *, n_latent, dpad):
    out_pad = encoder_pallas(x.astype(jnp.float32), wts, bn, alphas, dpad=dpad)
    return out_pad[:, :n_latent]


def encoder_forward(x, params):
    return _forward_impl(
        x, params["wts"], params["bn"], params["alphas"],
        n_latent=params["sizes"][-1], dpad=params["dpad"],
    )


if __name__ == "__main__":
    key = jax.random.PRNGKey(0)
    key, kx, kp = jax.random.split(key, 3)

    batch = 8
    n_input = 32
    layer_sizes = [64, 48]
    n_latent = 16

    x = jax.random.normal(kx, (batch, n_input), jnp.float32)
    params = init_encoder_params(kp, n_input, n_latent, layer_sizes)

    out = encoder_forward(x, params)
    jax.block_until_ready(out)
    assert out.shape == (batch, n_latent), out.shape
    assert bool(jnp.all(jnp.isfinite(out)))
    print("KERNEL_OK")
</pallas_src>

<mosaic_0001>
module attributes {stable_mosaic.version = 11 : i64} {
  func.func @_encoder_kernel(%arg0: i32, %arg1: memref<8x32xf32, #tpu.memory_space<vmem>>, %arg2: memref<1x128x128xbf16, #tpu.memory_space<vmem>>, %arg3: memref<1x2x128xf32, #tpu.memory_space<vmem>>, %arg4: memref<3xf32, #tpu.memory_space<smem>>, %arg5: memref<8x128xf32, #tpu.memory_space<vmem>>) attributes {dimension_semantics = [#tpu.dimension_semantics<arbitrary>], iteration_bounds = array<i64: 3>, scalar_prefetch = 0 : i64, scratch_operands = 0 : i64, tpu.core_type = #tpu.core_type<tc>, window_params = [{pipeline_mode = #tpu.pipeline_mode<synchronous>, transform_indices = @transform_0, window_bounds = array<i64: 8, 32>}, {transform_indices = @transform_1, window_bounds = array<i64: 1, 128, 128>}, {transform_indices = @transform_2, window_bounds = array<i64: 1, 2, 128>}, {transform_indices = @transform_3, window_bounds = array<i64: 3>}, {pipeline_mode = #tpu.pipeline_mode<synchronous>, transform_indices = @transform_4, window_bounds = array<i64: 8, 128>}]} {
    %c0_i32 = arith.constant 0 : i32
    %0 = arith.cmpi eq, %arg0, %c0_i32 : i32
    %1 = arith.extui %0 : i1 to i32
    %c0_i32_0 = arith.constant 0 : i32
    %2 = arith.cmpi ne, %1, %c0_i32_0 : i32
    scf.if %2 {
      %cst_18 = arith.constant 0.000000e+00 : f32
      %39 = vector.broadcast %cst_18 : f32 to vector<8x128xf32>
      %c0_19 = arith.constant 0 : index
      %c0_20 = arith.constant 0 : index
      %40 = vector.load %arg5[%c0_19, %c0_20] : memref<8x128xf32, #tpu.memory_space<vmem>>, vector<8x128xf32>
      tpu.vector_store %arg5[%c0_19, %c0_20], %39 {strides = array<i32>} : memref<8x128xf32, #tpu.memory_space<vmem>>, vector<8x128xf32>,
      %c0_21 = arith.constant 0 : index
      %c0_22 = arith.constant 0 : index
      %41 = vector.load %arg1[%c0_21, %c0_22] : memref<8x32xf32, #tpu.memory_space<vmem>>, vector<8x32xf32>
      %c0_23 = arith.constant 0 : index
      %c0_24 = arith.constant 0 : index
      %42 = vector.load %arg5[%c0_23, %c0_24] : memref<8x128xf32, #tpu.memory_space<vmem>>, vector<8x32xf32>
      tpu.vector_store %arg5[%c0_23, %c0_24], %41 {strides = array<i32>} : memref<8x128xf32, #tpu.memory_space<vmem>>, vector<8x32xf32>,
    } else {
    }
    %c0 = arith.constant 0 : index
    %c0_1 = arith.constant 0 : index
    %3 = vector.load %arg5[%c0, %c0_1] : memref<8x128xf32, #tpu.memory_space<vmem>>, vector<8x128xf32>
    %c0_2 = arith.constant 0 : index
    %c0_3 = arith.constant 0 : index
    %c0_4 = arith.constant 0 : index
    %4 = vector.load %arg2[%c0_2, %c0_3, %c0_4] : memref<1x128x128xbf16, #tpu.memory_space<vmem>>, vector<1x128x128xbf16>
    %5 = vector.shape_cast %4 : vector<1x128x128xbf16> to vector<128x128xbf16>
    %6 = arith.truncf %3 : vector<8x128xf32> to vector<8x128xbf16>
    %cst = arith.constant dense<0.000000e+00> : vector<8x128xf32>
    %7 = tpu.matmul %6, %5, %cst {dimension_numbers = #tpu.dot_dimension_numbers<[1], [0], [0], [1], [0, 0, 1, 1], [], []>} : vector<8x128xbf16>, vector<128x128xbf16>, vector<8x128xf32> -> vector<8x128xf32>
    %cst_5 = arith.constant dense<0.000000e+00> : vector<128xf32>
    %8 = vector.multi_reduction <add>, %7, %cst_5 [0] : vector<8x128xf32> to vector<128xf32>
    %9 = vector.shape_cast %8 : vector<128xf32> to vector<1x128xf32>
    %cst_6 = arith.constant 1.250000e-01 : f32
    %10 = vector.broadcast %cst_6 : f32 to vector<1x128xf32>
    %11 = arith.mulf %9, %10 : vector<1x128xf32>
    %12 = vector.broadcast %11 : vector<1x128xf32> to vector<8x128xf32>
    %13 = arith.subf %7, %12 : vector<8x128xf32>
    %14 = arith.mulf %13, %13 : vector<8x128xf32>
    %cst_7 = arith.constant dense<0.000000e+00> : vector<128xf32>
    %15 = vector.multi_reduction <add>, %14, %cst_7 [0] : vector<8x128xf32> to vector<128xf32>
    %16 = vector.shape_cast %15 : vector<128xf32> to vector<1x128xf32>
    %cst_8 = arith.constant 1.250000e-01 : f32
    %17 = vector.broadcast %cst_8 : f32 to vector<1x128xf32>
    %18 = arith.mulf %16, %17 : vector<1x128xf32>
    %cst_9 = arith.constant 9.99999974E-6 : f32
    %19 = vector.broadcast %cst_9 : f32 to vector<1x128xf32>
    %20 = arith.addf %18, %19 : vector<1x128xf32>
    %21 = math.rsqrt %20 : vector<1x128xf32>
    %c0_10 = arith.constant 0 : index
    %c0_11 = arith.constant 0 : index
    %c0_12 = arith.constant 0 : index
    %22 = vector.load %arg3[%c0_10, %c0_11, %c0_12] : memref<1x2x128xf32, #tpu.memory_space<vmem>>, vector<1x1x128xf32>
    %23 = vector.shape_cast %22 : vector<1x1x128xf32> to vector<1x128xf32>
    %c0_13 = arith.constant 0 : index
    %c1 = arith.constant 1 : index
    %c0_14 = arith.constant 0 : index
    %24 = vector.load %arg3[%c0_13, %c1, %c0_14] : memref<1x2x128xf32, #tpu.memory_space<vmem>>, vector<1x1x128xf32>
    %25 = vector.shape_cast %24 : vector<1x1x128xf32> to vector<1x128xf32>
    %26 = arith.mulf %23, %21 : vector<1x128xf32>
    %27 = vector.broadcast %26 : vector<1x128xf32> to vector<8x128xf32>
    %28 = arith.mulf %13, %27 : vector<8x128xf32>
    %29 = vector.broadcast %25 : vector<1x128xf32> to vector<8x128xf32>
    %30 = arith.addf %28, %29 : vector<8x128xf32>
    %31 = arith.index_cast %arg0 : i32 to index
    %32 = memref.load %arg4[%31] : memref<3xf32, #tpu.memory_space<smem>>
    %cst_15 = arith.constant 0.000000e+00 : f32
    %33 = vector.broadcast %cst_15 : f32 to vector<8x128xf32>
    %34 = arith.cmpf ogt, %30, %33 : vector<8x128xf32>
    %35 = vector.broadcast %32 : f32 to vector<8x128xf32>
    %36 = arith.mulf %35, %30 : vector<8x128xf32>
    %37 = arith.select %34, %30, %36 : vector<8x128xi1>, vector<8x128xf32>
    %c0_16 = arith.constant 0 : index
    %c0_17 = arith.constant 0 : index
    %38 = vector.load %arg5[%c0_16, %c0_17] : memref<8x128xf32, #tpu.memory_space<vmem>>, vector<8x128xf32>
    tpu.vector_store %arg5[%c0_16, %c0_17], %37 {strides = array<i32>} : memref<8x128xf32, #tpu.memory_space<vmem>>, vector<8x128xf32>,
    return
  }
  func.func @transform_0(%arg0: i32) -> (i32, i32) {
    %c0_i32 = arith.constant 0 : i32
    %c0_i32_0 = arith.constant 0 : i32
    %c0_i32_1 = arith.constant 0 : i32
    return %c0_i32, %c0_i32_0 : i32, i32
  }
  func.func @transform_1(%arg0: i32) -> (i32, i32, i32) {
    %c0_i32 = arith.constant 0 : i32
    %c0_i32_0 = arith.constant 0 : i32
    %c0_i32_1 = arith.constant 0 : i32
    return %arg0, %c0_i32, %c0_i32_0 : i32, i32, i32
  }
  func.func @transform_2(%arg0: i32) -> (i32, i32, i32) {
    %c0_i32 = arith.constant 0 : i32
    %c0_i32_0 = arith.constant 0 : i32
    %c0_i32_1 = arith.constant 0 : i32
    return %arg0, %c0_i32, %c0_i32_0 : i32, i32, i32
  }
  func.func @transform_3(%arg0: i32) -> i32 {
    %c0_i32 = arith.constant 0 : i32
    %c0_i32_0 = arith.constant 0 : i32
    return %c0_i32 : i32
  }
  func.func @transform_4(%arg0: i32) -> (i32, i32) {
    %c0_i32 = arith.constant 0 : i32
    %c0_i32_0 = arith.constant 0 : i32
    %c0_i32_1 = arith.constant 0 : i32
    return %c0_i32, %c0_i32_0 : i32, i32
  }
}

</mosaic_0001>

<bundles_post_ra>
// kernel: _forward_impl.1
= control target key start
LH: loop header
LB: loop body
LE: loop exit
PB: predicated region body
PF: predicated region fallthrough
CT: control target
= control target key end

     0   :  { %9 = vsyncpa [#allocation3], 0  ;;  %s1005_s0 = inlined_call_operand.hbm [shape: f32[8,32], index: 0, kind: input, shape index: {}]   ;;  %s1006_s1 = inlined_call_operand.hbm [shape: bf16[3,128,128], index: 1, kind: input, shape index: {}]   ;;  %s1007_s2 = inlined_call_operand.hbm [shape: f32[3,2,128], index: 2, kind: input, shape index: {}]   ;;  %s1008_s3 = inlined_call_operand.vmem [shape: f32[3], index: 3, kind: input, shape index: {}]   ;;  %s1009_s4 = inlined_call_operand.hbm [shape: f32[8,128], index: 4, kind: output, shape index: {}]  }
   0x1   :  { %10 = vsyncpa [#allocation7], 0 }
   0x2   :  { %12 = vsyncpa [#allocation7 + $0x1], 0 }
   0x3   :  { %13 = vsyncpa [#allocation5], 0 }
   0x4   :  { %14 = vsyncpa [#allocation4], 0  ;;  %s852_s15 = smov 0   ;;  %s854_s16 = smov 0  }
   0x5   :  { %s856_s17 = smov 0   ;;  %s858_s18 = smov 0  }
   0x6 LB: > { %s873_s19 = sadd.s32 1, %s819_s18   ;;  %s48_s20 = sadd.s32 1, %s815_s17  ;;  %s819_s18 = sphi %s858_s18, %s1016_s18   ;;  %s815_s17 = sphi %s856_s17, %s1015_s17   ;;  %s811_s16 = sphi %s854_s16, %s1014_s16   ;;  %s807_s15 = sphi %s852_s15, %s1013_s15  }
   0x7   : > { %s45_s21 = ssub.s32 %s819_s18, %s873_s19  ;;  %p55_p0 = scmp.ne.s32.totalorder %s815_s17, %s811_s16 }
   0x8   : > { %p46_p1 = scmp.eq.s32.totalorder %s45_s21, 0  ;;  %p56_p2 = scmp.eq.s32.totalorder %s819_s18, 0 }
   0x9   : > { %p594_p3 = scmp.lt.s32.totalorder %s819_s18, 3  ;;  %s175_s23 = sand.u32 1, %s819_s18  }
   0xa   : > { %s883_s22 = scalar_select %p46_p1, %s815_s17, %s48_s20  }
   0xb   : > { %p57_p4 = por %p56_p2, %p55_p0  ;;  %s177_s24 = sand.u32 1, %s815_s17  }
   0xc   : > { %s506_s25 = sshll.u32 %s177_s24, 6  ;;  %s553_s26 = sshll.u32 %s819_s18, 6 }
   0xd   : > { %s184_s29 = scalar_lea.hbm %s1006_s1, %s553_s26  ;;  %s179_s5 = scalar_lea.vmem [#allocation6], %s506_s25 }
   0xe   : > { %s185_s30 = sshll.u32 %s184_s29, 4  ;;  %s187_s6 = sshll.u32 %s179_s5, 4  ;;  %s186_s30 = int_to_ptr.hbm [resolvable:$true] %s185_s30  ;;  %s188_s6 = int_to_ptr.vmem [resolvable:$true] %s187_s6 }
   0xf   : > { %p895_p5 = pnand %p594_p3, %p57_p4  ;;  %s899_s8 = scalar_lea.sflag [#allocation7], %s175_s23 }
  0x10   : > { %s640_s9 = sshra.s32 %s186_s30, 4  ;;  %s647_s13 = scalar_lea.hbm %s1006_s1, 192  ;;  %s641_s9 = int_to_ptr.hbm [resolvable:$true] %s640_s9 }
  0x11   : > { %s642_s10 = scalar_lea.hbm %s641_s9, 64  ;;  %p644_p7 = pneg %p895_p5 }
  0x12   : > { %p643_p6 = scmp.ne.s32.totalorder %s641_s9, %s642_s10  ;;  %p648_p10 = scmp.lt.s32.totalorder %s641_s9, %s1006_s1 }
  0x13   : > { %p649_p11 = scmp.lt.s32.totalorder %s647_s13, %s642_s10 }
  0x14   : > { %p645_p8 = pnand %p644_p7, %p643_p6 }
  0x15   : > { %p650_p12 = por %p649_p11, %p648_p10 }
  0x16   : > { %p646_p9 = pneg %p645_p8 }
  0x18   : > { %p651_p13 = pnand %p650_p12, %p646_p9 }
  0x1a   : > { %654 = shalt.err (!%p651_p13)
}
  0x1b   : > { %s821_s21 = smov 64   ;;  %s822_s23 = smov 4  }
  0x1c   : > { %588 = dma.hbm_to_vmem [thread:$0]  (!%p895_p5), %s186_s30, 1024, %s188_s6, %s899_s8, %s821_s21, %s821_s21, %s822_s23  }
  0x1d   : > { %s916_s25 = sadd.s32 4294967295, %s819_s18   ;;  %p61_p0 = scmp.ne.s32.totalorder %s811_s16, %s807_s15 }
  0x1e   : > { %p62_p1 = scmp.eq.s32.totalorder %s916_s25, 0  ;;  %p502_p2 = scmp.ge.s32.totalorder %s819_s18, 1 }
  0x1f   : > { %p140_p3 = scmp.lt.s32.totalorder %s819_s18, 4  ;;  %p503_p4 = scmp.ne.s32.totalorder %s916_s25, 0 }
  0x20   : > { %p926_p6 = por %p62_p1, %p61_p0  ;;  %s152_s29 = sshll.u32 %s1005_s0, 4  ;;  %s153_s29 = int_to_ptr.hbm [resolvable:$true] %s152_s29 }
  0x21   : > { %p933_p8 = pnand %p502_p2, %p140_p3  ;;  %s164_s6 = sshll.u32 %s1008_s3, 4  ;;  %s165_s6 = int_to_ptr.vmem [resolvable:$true] %s164_s6 }
  0x22   : > { %s823_s9 = smov [#allocation2]   ;;  %s509_s11 = sshll.u32 %s177_s24, 1 }
  0x23   : > { %p578_p9 = pneg %p933_p8  ;;  %s154_s10 = sshll.u32 %s823_s9, 4  ;;  %s155_s10 = int_to_ptr.vmem [resolvable:$true] %s154_s10 }
  0x24   : > { %s510_s12 = sshll.u32 %s819_s18, 1  ;;  %s824_s13 = smov [#allocation9]  }
  0x25   : > { %p579_p10 = pnand %p578_p9, %p62_p1  ;;  %s205_s21 = scalar_lea.hbm %s1007_s2, %s510_s12 }
  0x26   : > { %s201_s23 = scalar_lea.vmem [#allocation8], %s509_s11  ;;  %s207_s28 = sshll.u32 %s205_s21, 4  ;;  %s208_s28 = int_to_ptr.hbm [resolvable:$true] %s207_s28 }
  0x27   : > { %581 = dma.hbm_to_vmem [thread:$0]  (!%p579_p10), %s153_s29, 128, %s155_s10, [#allocation3]  }
  0x28   : > { %584 = dma.vmem_to_smem (!%p579_p10), %s165_s6, 16, %s824_s13, [#allocation5]  }
  0x29   : > { %s209_s27 = sshll.u32 %s201_s23, 4  ;;  %s715_s15 = sshra.s32 %s208_s28, 4  ;;  %s210_s27 = int_to_ptr.vmem [resolvable:$true] %s209_s27  ;;  %s716_s15 = int_to_ptr.hbm [resolvable:$true] %s715_s15 }
  0x2a   : > { %s717_s5 = scalar_lea.hbm %s716_s15, 2  ;;  %s722_s29 = scalar_lea.hbm %s1007_s2, 6 }
  0x2b   : > { %p718_p11 = scmp.ne.s32.totalorder %s716_s15, %s717_s5  ;;  %p723_p0 = scmp.lt.s32.totalorder %s716_s15, %s1007_s2 }
  0x2c   : > { %p724_p2 = scmp.lt.s32.totalorder %s722_s29, %s717_s5 }
  0x2d   : > { %p720_p12 = pnand %p718_p11, %p644_p7 }
  0x2e   : > { %p725_p3 = por %p724_p2, %p723_p0 }
  0x2f   : > { %p721_p13 = pneg %p720_p12 }
  0x31   : > { %p726_p9 = pnand %p725_p3, %p721_p13 }
  0x33   : > { %729 = shalt.err (!%p726_p9)
}
  0x34   : > { %591 = dma.hbm_to_vmem [thread:$0]  (!%p895_p5), %s208_s28, 32, %s210_s27, %s899_s8  }
  0x35   : > { %218 = sbr.rel (%p933_p8) target bundleno = 301 (0x12d), region = 36 }
  0x3a   : > { %790 = dma.done.wait (%p62_p1), [#allocation3], 128  }
  0x3b   : > { %792 = vsyncadd (%p62_p1), [#allocation3], 4294967168  ;;  %s225_s10 = sand.u32 1, %s916_s25   ;;  %s227_s11 = sand.u32 1, %s811_s16  }
  0x3c   : > { %s513_s12 = sshll.u32 %s227_s11, 6  ;;  %s226_s13 = scalar_lea.sflag [#allocation7], %s225_s10 }
  0x3d   : > { %s229_s14 = scalar_lea.vmem [#allocation6], %s513_s12 }
  0x3e   : > { %794 = dma.done.wait (%p926_p6), %s226_s13, 1056  }
  0x3f   : > { %796 = vsyncadd (%p926_p6), %s226_s13, 4294966240  ;;  %s974_s7 = sshll.u32 %s227_s11, 1 }
  0x40   : > { %s239_s8 = scalar_lea.vmem [#allocation8], %s974_s7 }
  0x41   : > { %798 = dma.done.wait (%p62_p1), [#allocation5], 16  }
  0x42   : > { %800 = vsyncadd (%p62_p1), [#allocation5], 4294967280 }
  0x43   : > { %250 = sfence }
  0x44   : > { %274 = sbr.rel (%p503_p4) target bundleno = 76 (0x4c), region = 56 }
  0x49   : > { %v276_v0 = vld [vmem:[#allocation2] sm:$0xff]  ;;  %vm277_vm0 = vcmask 261120   ;;  %v825_v1 = vmov 0.0  }
  0x4a   : > { %275 = vst [vmem:[#allocation10] sm:$0xff] %v825_v1 }
  0x4b   : > { %278 = vst.msk [vmem:[#allocation10] sm:$0xff] %vm277_vm0, %v276_v0 }
  0x4c PF: > { %v561_v2 = vld [vmem:[%s229_s14 + $0x38] sm:$0xff]  ;;  %v560_v3 = vld [vmem:[%s229_s14 + $0x30] sm:$0xff]  ;;  %v559_v4 = vld [vmem:[%s229_s14 + $0x28] sm:$0xff]  ;;  %s392_s26 = sld [smem:[#allocation9 + %s916_s25]]  ;;  %s826_s30 = smov [#allocation10]  }
  0x4d   : > { %345 = vmatpush.bf16.msra.mxu0 %v561_v2  ;;  %v558_v5 = vld [vmem:[%s229_s14 + $0x20] sm:$0xff]  ;;  %v557_v6 = vld [vmem:[%s229_s14 + $0x18] sm:$0xff]  ;;  %v556_v7 = vld [vmem:[%s229_s14 + $0x10] sm:$0xff]  ;;  %s404_s20 = sshll.u32 %s826_s30, 4  ;;  %s406_s27 = sshll.u32 %s1009_s4, 4  ;;  %s405_s20 = int_to_ptr.vmem [resolvable:$true] %s404_s20  ;;  %s407_s27 = int_to_ptr.hbm [resolvable:$true] %s406_s27 }
  0x4e   : > { %v555_v8 = vld [vmem:[%s229_s14 + $0x8] sm:$0xff]  ;;  %v554_v9 = vld [vmem:[%s229_s14] sm:$0xff]  ;;  %p597_p5 = scmp.eq.s32.totalorder %s916_s25, 2 }
  0x4f   : > { %v385_v37 = vld [vmem:[%s239_s8] sm:$0x1]  ;;  %v637_v41 = vld [vmem:[%s239_s8 + $0x1] ss:$0 sm:$0xff] }
  0x51   : > { %346 = vmatpush.bf16.msra.mxu0 %v560_v3 }
  0x52   : > { %v279_v10 = vld [vmem:[#allocation10] sm:$0xff]  ;;  %v394_v43 = vstv %s392_s26 }
  0x53   : > { %v296_v11 = vpack.c.bf16 %v279_v10, %v279_v10 }
  0x55   : > { %347 = vmatpush.bf16.msra.mxu0 %v559_v4 }
  0x59   : > { %348 = vmatpush.bf16.msra.mxu0 %v558_v5 }
  0x5d   : > { %349 = vmatpush.bf16.msra.mxu0 %v557_v6 }
  0x61   : > { %350 = vmatpush.bf16.msra.mxu0 %v556_v7 }
  0x65   : > { %351 = vmatpush.bf16.msra.mxu0 %v555_v8 }
  0x69   : > { %352 = vmatpush.bf16.msra.mxu0 %v554_v9 }
  0x6c   : > { %353 = vmatmul.bf16.vlgmr.msra.gmra.mxu0 %v296_v11 }
  0xe9   : > { %v354_v12 = vpop.f32.mrf.mxu0 }
  0xea   : > { %v358_v13 = vrot.slane %v354_v12, 4 }
  0xec   : > { %v359_v14 = vadd.f32 %v358_v13, %v354_v12 }
  0xee   : > { %v360_v15 = vrot.slane %v359_v14, 2 }
  0xf0   : > { %v361_v16 = vadd.f32 %v360_v15, %v359_v14 }
  0xf1   : > { %v356_v17 = vpop.f32.mrf.mxu0 }
  0xf2   : > { %v362_v18 = vrot.slane %v361_v16, 1 }
  0xf4   : > { %v363_v19 = vadd.f32 %v362_v18, %v361_v16 }
  0xf6   : > { %v364_v20 = vmul.f32 0.125, %v363_v19 }
  0xf8   : > { %v365_v21 = vsub.f32 %v354_v12, %v364_v20 }
  0xfa   : > { %v366_v22 = vmul.f32 %v365_v21, %v365_v21 }
  0xfc   : > { %v367_v23 = vrot.slane %v366_v22, 4 }
  0xfe   : > { %v368_v24 = vadd.f32 %v367_v23, %v366_v22 }
 0x100   : > { %v369_v25 = vrot.slane %v368_v24, 2 }
 0x102   : > { %v370_v26 = vadd.f32 %v369_v25, %v368_v24 }
 0x104   : > { %v371_v27 = vrot.slane %v370_v26, 1 }
 0x106   : > { %v372_v28 = vadd.f32 %v371_v27, %v370_v26 }
 0x108   : > { %v373_v29 = vmul.f32 0.125, %v372_v28 }
 0x10a   : > { %v374_v30 = vadd.f32 1e-05, %v373_v29 }
 0x10c   : > { %638 = vrsqrt.f32 %v374_v30  ;;  %vm381_vm2 = vweird.f32 %v374_v30 }
 0x112   : > { %v639_v31 = vpop.eup %638 }
 0x113   : > { %v376_v32 = vmul.f32 %v639_v31, %v374_v30  ;;  %vm382_vm1 = vweird.f32 %v639_v31 }
 0x114   : > { %vm383_vm3 = vmor %vm381_vm2, %vm382_vm1 }
 0x115   : > { %v377_v33 = vmul.f32 %v639_v31, %v376_v32 }
 0x117   : > { %v378_v34 = vmul.f32 0.5, %v377_v33 }
 0x119   : > { %v379_v35 = vsub.f32 1.5, %v378_v34 }
 0x11b   : > { %v380_v36 = vmul.f32 %v639_v31, %v379_v35 }
 0x11d   : > { %v384_v38 = vsel %vm383_vm3, %v639_v31, %v380_v36 }
 0x11e   : > { %v387_v39 = vmul.f32 %v385_v37, %v384_v38 }
 0x120   : > { %v388_v40 = vperm.slane %v387_v39, 0 }
 0x122   : > { %v389_v42 = vmul.f32 %v388_v40, %v365_v21 }
 0x124   : > { %v391_v44 = vadd.f32 %v637_v41, %v389_v42 }
 0x126   : > { %vm393_vm4 = vcmp.gt.f32.partialorder %v391_v44, 0.0  ;;  %v395_v45 = vmul.f32 %v394_v43, %v391_v44 }
 0x128   : > { %v396_v46 = vsel %vm393_vm4, %v391_v44, %v395_v45 }
 0x129   : > { %397 = vst [vmem:[#allocation10] sm:$0xff] %v396_v46 }
 0x12a   : > { %575 = dma.vmem_to_hbm [thread:$0]  (%p597_p5), %s405_s20, 128, %s407_s27, [#allocation4]  }
 0x12b   : > { %802 = dma.done.wait (%p597_p5), [#allocation4], 128  }
 0x12c   : > { %804 = vsyncadd (%p597_p5), [#allocation4], 4294967168 }
 0x12d PF: > { %p17_p7 = scmp.ge.s32.totalorder %s873_s19, 5   ;;  %s1013_s15 = smov %s811_s16 }
 0x12e   : > { %s1014_s16 = smov %s815_s17  ;;  %s1015_s17 = smov %s883_s22 }
 0x12f   : > { %s1016_s18 = smov %s873_s19  ;;  %19 = sbr.rel (!%p17_p7) target bundleno = 6 (0x6), region = 98 }
 0x134   :  { %420 = vsyncpa [#allocation3], 1 }
 0x135   :  { %422 = vsyncpa [#allocation3 + $0x1], 1 }
 0x136   :  { %423 = vsyncpa [#allocation7], 1 }
 0x137   :  { %425 = vsyncpa [#allocation7 + $0x1], 1 }
 0x138   :  { %426 = vsyncpa [#allocation4], 1 }
 0x139   :  { %428 = vsyncpa [#allocation4 + $0x1], 1 }
 0x13a   :  { %429 = vsyncpa [#allocation5], 1 }
 0x13b   :  { %431 = vsyncpa [#allocation5 + $0x1], 1 }

</bundles_post_ra>
